<compile_context>
chip_gen: v7x
topology: tpu7x:2x2x1
jax: 0.10.0
libtpu: 0.0.40
codegen_flags: <defaults>
</compile_context>

<pallas_src>
import functools
import math

import jax
import jax.numpy as jnp
from jax import lax
from jax.experimental import pallas as pl
from jax.experimental.pallas import tpu as pltpu


_LANES = 128
_CHUNK_ROWS = 32  # rows per in-register chunk (keeps f32 accumulators in vregs)


def _cdiv(a, b):
    return -(-a // b)


def _round_up(x, m):
    return ((x + m - 1) // m) * m


def _vmem_capacity_bytes():
    try:
        cap = getattr(pltpu.get_tpu_info(), "vmem_capacity_bytes", None)
        if cap:
            return int(cap)
    except Exception:
        pass
    return 64 * 1024 * 1024  # conservative default (v7x per-core VMEM)


def _focal_pow(omp, gamma):
    # cheap forms for common gammas; jnp.power = exp(g*log(x)) = 2 EUP ops
    if gamma == 0:
        return jnp.ones_like(omp)
    if gamma == 1:
        return omp
    if gamma == 2:
        return omp * omp
    if gamma == 3:
        return omp * omp * omp
    if gamma == 4:
        sq = omp * omp
        return sq * sq
    if gamma == 0.5:
        return jnp.sqrt(omp)
    return jnp.power(omp, jnp.float32(gamma))


def _focal_kernel(x_ref, t_ref, out_ref, *, n_classes, gamma, alpha,
                  n_valid, tile_rows):
    """One (batch, row-tile) grid step.

    x_ref:   (1, C, tile_rows, 128) logits, native dtype (cast to f32 per chunk)
    t_ref:   (1, tile_rows, 128)    int8/int32 labels
    out_ref: (1, 1, 1, 128)         f32 per-lane partial loss sums of this tile
    """
    j = pl.program_id(1)
    tile_base = j * (tile_rows * _LANES)  # linear pixel index of tile start

    def chunk_loss(r0, rows, base_idx):
        # labels: widened once per chunk (int8 in HBM/VMEM -> int32 in vregs)
        t = t_ref[0, pl.ds(r0, rows), :].astype(jnp.int32)

        # pass 1: per-pixel max over classes in the *native* dtype (exact for
        # max, avoids C extra converts for bf16), convert the result once.
        m = x_ref[0, 0, pl.ds(r0, rows), :]
        for c in range(1, n_classes):
            m = jnp.maximum(m, x_ref[0, c, pl.ds(r0, rows), :])
        m = m.astype(jnp.float32)

        # pass 2: sum-of-exp + gather of the target-class logit.  Only two
        # (rows,128) f32 accumulators stay live across the class loop, so with
        # rows <= 32 everything fits in vregs (no spilled vst on v5e).
        s = jnp.zeros_like(m)
        x_t = jnp.zeros_like(m)
        for c in range(n_classes):
            xc = x_ref[0, c, pl.ds(r0, rows), :].astype(jnp.float32)
            s = s + jnp.exp(xc - m)
            x_t = jnp.where(t == c, xc, x_t)

        logpt = x_t - (m + jnp.log(s))        # log_softmax at the target class
        pt = jnp.exp(logpt)
        focal = _focal_pow(1.0 - pt, gamma)   # no clamp -> matches torch

        if alpha is not None:
            # alpha gather done post-loop straight from t (no extra live
            # accumulator inside the class loop; one select for C == 2)
            at = jnp.full_like(logpt, jnp.float32(alpha[0]))
            for c in range(1, n_classes):
                at = jnp.where(t == c, jnp.float32(alpha[c]), at)
            logpt = logpt * at

        loss = -focal * logpt
        # mask the spatial tail: lane padding and/or out-of-bounds row-tiles
        valid = (base_idx + (tile_base + r0 * _LANES)) < n_valid
        loss = jnp.where(valid, loss, 0.0)
        return jnp.sum(loss, axis=0, keepdims=True)  # (1,128) sublane reduce

    n_full = tile_rows // _CHUNK_ROWS
    tail = tile_rows - n_full * _CHUNK_ROWS

    acc = jnp.zeros((1, _LANES), jnp.float32)
    if n_full > 0:
        # hoisted once per grid step (JAX does not CSE broadcast_in_dim)
        base = (lax.broadcasted_iota(jnp.int32, (_CHUNK_ROWS, _LANES), 0) * _LANES
                + lax.broadcasted_iota(jnp.int32, (_CHUNK_ROWS, _LANES), 1))

        def body(i, acc):
            r0 = pl.multiple_of(i * _CHUNK_ROWS, _CHUNK_ROWS)
            return acc + chunk_loss(r0, _CHUNK_ROWS, base)

        acc = lax.fori_loop(0, n_full, body, acc)
    if tail > 0:
        base_t = (lax.broadcasted_iota(jnp.int32, (tail, _LANES), 0) * _LANES
                  + lax.broadcasted_iota(jnp.int32, (tail, _LANES), 1))
        acc = acc + chunk_loss(n_full * _CHUNK_ROWS, tail, base_t)

    out_ref[...] = acc.reshape(1, 1, 1, _LANES)


def focal_loss(inputs, target, gamma=2, alpha=None, size_average=True,
               tile_rows_cap=None):
    """inputs: (N, C, *spatial) logits; target: (N, *spatial) integer labels."""
    N = inputs.shape[0]
    C = inputs.shape[1]
    HW = int(math.prod(inputs.shape[2:])) if inputs.ndim > 2 else 1

    x = inputs.reshape(N, C, HW)   # free reshape, native dtype kept in HBM
    t = target.reshape(N, HW)

    # --- spatial layout: rows of 128 lanes, class dim leading (non-tiled) ---
    HW_pad = _round_up(HW, _LANES)
    R = HW_pad // _LANES

    # labels as int8 when possible: with bf16 logits and small C an int32
    # target would otherwise be ~half of all DMA bytes.  (Callers that already
    # hold uint8/int8 labels skip the cast entirely.)
    use_i8 = (C <= 127) and (R >= 32)
    t = t.astype(jnp.int8 if use_i8 else jnp.int32)

    if HW_pad != HW:
        # Rare: only fires when H*W is not a multiple of 128; this is the
        # minimal lane pad.  Row/tile granularity is handled by in-kernel
        # masking of OOB row-tiles, so no other copy of the logits is made.
        x = jnp.pad(x, ((0, 0), (0, 0), (0, HW_pad - HW)))
        t = jnp.pad(t, ((0, 0), (0, HW_pad - HW)))

    x4 = x.reshape(N, C, R, _LANES)
    t3 = t.reshape(N, R, _LANES)

    # --- tile size: as large as the per-generation VMEM budget allows, while
    #     keeping enough grid steps for DMA/compute overlap ---
    vmem_cap = _vmem_capacity_bytes()            # 128 MiB v5e/v6e, 64 MiB v7x
    x_bytes = jnp.dtype(x4.dtype).itemsize
    t_bytes = 1 if use_i8 else 4
    per_row = 2 * _LANES * (C * x_bytes + t_bytes)   # double-buffered bytes/row
    cap_rows = max(32, min(2048, ((vmem_cap // 4) // max(per_row, 1)) // 32 * 32))
    if tile_rows_cap is not None:
        cap_rows = max(32, min(cap_rows, (tile_rows_cap // 32) * 32))

    nt_target = _cdiv(8, N)                      # aim for >= ~8 total grid steps
    tr = min(max(_cdiv(R, nt_target), 512), cap_rows)
    if tr >= R:
        tile_rows = R                            # full-dim block (any R)
    else:
        tile_rows = max(32, (tr // 32) * 32)     # 32-aligned (int8-safe) tiles
    NT = _cdiv(R, tile_rows)                     # last tile may be partial (masked)

    # alpha handling mirrors the PyTorch module (constructor-time constants)
    if alpha is None:
        alpha_t = None
    elif isinstance(alpha, (float, int)):
        assert C == 2, "scalar alpha implies a binary (C==2) problem"
        alpha_t = (float(alpha), 1.0 - float(alpha))
    else:
        alpha_t = tuple(float(a) for a in alpha)
        assert len(alpha_t) == C

    kernel = functools.partial(
        _focal_kernel, n_classes=C, gamma=gamma, alpha=alpha_t,
        n_valid=HW, tile_rows=tile_rows)

    out = pl.pallas_call(
        kernel,
        out_shape=jax.ShapeDtypeStruct((N, NT, 1, _LANES), jnp.float32),
        grid_spec=pltpu.PrefetchScalarGridSpec(
            num_scalar_prefetch=0,
            grid=(N, NT),
            in_specs=[
                pl.BlockSpec((1, C, tile_rows, _LANES), lambda n, j: (n, 0, j, 0)),
                pl.BlockSpec((1, tile_rows, _LANES), lambda n, j: (n, j, 0)),
            ],
            out_specs=pl.BlockSpec((1, 1, 1, _LANES), lambda n, j: (n, j, 0, 0)),
        ),
        compiler_params=pltpu.CompilerParams(
            # both axes independent -> a 2-TC chip (v7x) can shard either one
            dimension_semantics=("parallel", "parallel"),
            vmem_limit_bytes=int(min(vmem_cap // 2, 64 * 1024 * 1024)),
        ),
    )(x4, t3)

    total = jnp.sum(out)  # tiny (N, NT, 1, 128) reduce in plain JAX
    if size_average:
        return total / (N * HW)   # PyTorch .mean() over all N*H*W pixels
    return total


def _ref_focal(x, y, gamma, alpha, size_average=True):
    """Pure-JAX reference, same math as the PyTorch module."""
    n, c = x.shape[0], x.shape[1]
    logits = jnp.transpose(x.reshape(n, c, -1), (0, 2, 1)).reshape(-1, c)
    tgt = y.reshape(-1)
    logp = jax.nn.log_softmax(logits, axis=-1)
    logpt = jnp.take_along_axis(logp, tgt[:, None], axis=1)[:, 0]
    pt = jnp.exp(logpt)
    if alpha is not None:
        at = jnp.asarray(alpha, jnp.float32)[tgt]
        logpt = logpt * at
    loss = -((1.0 - pt) ** gamma) * logpt
    return jnp.mean(loss) if size_average else jnp.sum(loss)


if __name__ == "__main__":
    key = jax.random.PRNGKey(0)
    k1, k2, k3, k4 = jax.random.split(key, 4)

    # --- case 1: baseline small shape, no alpha ---
    N, C, H, W = 2, 4, 16, 16
    x1 = jax.random.normal(k1, (N, C, H, W), dtype=jnp.float32)
    y1 = jax.random.randint(k2, (N, H, W), 0, C, dtype=jnp.int32)
    got1 = focal_loss(x1, y1, gamma=2, alpha=None, size_average=True)
    jax.block_until_ready(got1)
    want1 = _ref_focal(x1, y1, 2, None)
    assert jnp.allclose(got1, want1, rtol=1e-4, atol=1e-5), (got1, want1)

    # --- case 2: multi-tile grid + OOB-tail masking + int8 labels + alpha ---
    N2, C2, H2, W2 = 1, 3, 80, 128
    alpha2 = [0.25, 0.5, 0.25]
    x2 = jax.random.normal(k3, (N2, C2, H2, W2), dtype=jnp.float32)
    y2 = jax.random.randint(k4, (N2, H2, W2), 0, C2, dtype=jnp.int32)
    got2 = focal_loss(x2, y2, gamma=2, alpha=alpha2, size_average=True,
                      tile_rows_cap=64)  # force NT=2 so the masked tail runs
    jax.block_until_ready(got2)
    want2 = _ref_focal(x2, y2, 2, alpha2)
    assert jnp.allclose(got2, want2, rtol=1e-4, atol=1e-5), (got2, want2)

    print("KERNEL_OK")
</pallas_src>

<mosaic_0001>
module attributes {stable_mosaic.version = 11 : i64} {
  func.func @_focal_kernel(%arg0: i32, %arg1: i32, %arg2: memref<1x4x2x128xf32, #tpu.memory_space<vmem>>, %arg3: memref<1x2x128xi32, #tpu.memory_space<vmem>>, %arg4: memref<1x1x1x128xf32, #tpu.memory_space<vmem>>) attributes {dimension_semantics = [#tpu.dimension_semantics<parallel>, #tpu.dimension_semantics<parallel>], iteration_bounds = array<i64: 2, 1>, scalar_prefetch = 0 : i64, scratch_operands = 0 : i64, tpu.core_type = #tpu.core_type<tc>, window_params = [{transform_indices = @transform_0, window_bounds = array<i64: 1, 4, 2, 128>}, {transform_indices = @transform_1, window_bounds = array<i64: 1, 2, 128>}, {transform_indices = @transform_2, window_bounds = array<i64: 1, 1, 1, 128>}]} {
    %c256_i32 = arith.constant 256 : i32
    %0 = arith.muli %arg1, %c256_i32 : i32
    %cst = arith.constant 0.000000e+00 : f32
    %1 = vector.broadcast %cst : f32 to vector<1x128xf32>
    %2 = tpu.iota {dimensions = array<i32: 0>} : vector<2x128xi32>
    %c128_i32 = arith.constant 128 : i32
    %3 = vector.broadcast %c128_i32 : i32 to vector<2x128xi32>
    %4 = arith.muli %2, %3 : vector<2x128xi32>
    %5 = tpu.iota {dimensions = array<i32: 1>} : vector<2x128xi32>
    %6 = arith.addi %4, %5 : vector<2x128xi32>
    %c0 = arith.constant 0 : index
    %c0_0 = arith.constant 0 : index
    %c0_1 = arith.constant 0 : index
    %7 = vector.load %arg3[%c0, %c0_0, %c0_1] : memref<1x2x128xi32, #tpu.memory_space<vmem>>, vector<1x2x128xi32>
    %8 = vector.shape_cast %7 : vector<1x2x128xi32> to vector<2x128xi32>
    %c0_2 = arith.constant 0 : index
    %c0_3 = arith.constant 0 : index
    %c0_4 = arith.constant 0 : index
    %c0_5 = arith.constant 0 : index
    %9 = vector.load %arg2[%c0_2, %c0_3, %c0_4, %c0_5] : memref<1x4x2x128xf32, #tpu.memory_space<vmem>>, vector<1x1x2x128xf32>
    %10 = vector.shape_cast %9 : vector<1x1x2x128xf32> to vector<2x128xf32>
    %c0_6 = arith.constant 0 : index
    %c1 = arith.constant 1 : index
    %c0_7 = arith.constant 0 : index
    %c0_8 = arith.constant 0 : index
    %11 = vector.load %arg2[%c0_6, %c1, %c0_7, %c0_8] : memref<1x4x2x128xf32, #tpu.memory_space<vmem>>, vector<1x1x2x128xf32>
    %12 = vector.shape_cast %11 : vector<1x1x2x128xf32> to vector<2x128xf32>
    %13 = arith.maximumf %10, %12 : vector<2x128xf32>
    %c0_9 = arith.constant 0 : index
    %c2 = arith.constant 2 : index
    %c0_10 = arith.constant 0 : index
    %c0_11 = arith.constant 0 : index
    %14 = vector.load %arg2[%c0_9, %c2, %c0_10, %c0_11] : memref<1x4x2x128xf32, #tpu.memory_space<vmem>>, vector<1x1x2x128xf32>
    %15 = vector.shape_cast %14 : vector<1x1x2x128xf32> to vector<2x128xf32>
    %16 = arith.maximumf %13, %15 : vector<2x128xf32>
    %c0_12 = arith.constant 0 : index
    %c3 = arith.constant 3 : index
    %c0_13 = arith.constant 0 : index
    %c0_14 = arith.constant 0 : index
    %17 = vector.load %arg2[%c0_12, %c3, %c0_13, %c0_14] : memref<1x4x2x128xf32, #tpu.memory_space<vmem>>, vector<1x1x2x128xf32>
    %18 = vector.shape_cast %17 : vector<1x1x2x128xf32> to vector<2x128xf32>
    %19 = arith.maximumf %16, %18 : vector<2x128xf32>
    %cst_15 = arith.constant 0.000000e+00 : f32
    %20 = vector.broadcast %cst_15 : f32 to vector<2x128xf32>
    %cst_16 = arith.constant 0.000000e+00 : f32
    %21 = vector.broadcast %cst_16 : f32 to vector<2x128xf32>
    %c0_17 = arith.constant 0 : index
    %c0_18 = arith.constant 0 : index
    %c0_19 = arith.constant 0 : index
    %c0_20 = arith.constant 0 : index
    %22 = vector.load %arg2[%c0_17, %c0_18, %c0_19, %c0_20] : memref<1x4x2x128xf32, #tpu.memory_space<vmem>>, vector<1x1x2x128xf32>
    %23 = vector.shape_cast %22 : vector<1x1x2x128xf32> to vector<2x128xf32>
    %24 = arith.subf %23, %19 : vector<2x128xf32>
    %25 = math.exp %24 : vector<2x128xf32>
    %26 = arith.addf %20, %25 : vector<2x128xf32>
    %c0_i32 = arith.constant 0 : i32
    %27 = vector.broadcast %c0_i32 : i32 to vector<2x128xi32>
    %28 = arith.cmpi eq, %8, %27 : vector<2x128xi32>
    %29 = arith.select %28, %23, %21 : vector<2x128xi1>, vector<2x128xf32>
    %c0_21 = arith.constant 0 : index
    %c1_22 = arith.constant 1 : index
    %c0_23 = arith.constant 0 : index
    %c0_24 = arith.constant 0 : index
    %30 = vector.load %arg2[%c0_21, %c1_22, %c0_23, %c0_24] : memref<1x4x2x128xf32, #tpu.memory_space<vmem>>, vector<1x1x2x128xf32>
    %31 = vector.shape_cast %30 : vector<1x1x2x128xf32> to vector<2x128xf32>
    %32 = arith.subf %31, %19 : vector<2x128xf32>
    %33 = math.exp %32 : vector<2x128xf32>
    %34 = arith.addf %26, %33 : vector<2x128xf32>
    %c1_i32 = arith.constant 1 : i32
    %35 = vector.broadcast %c1_i32 : i32 to vector<2x128xi32>
    %36 = arith.cmpi eq, %8, %35 : vector<2x128xi32>
    %37 = arith.select %36, %31, %29 : vector<2x128xi1>, vector<2x128xf32>
    %c0_25 = arith.constant 0 : index
    %c2_26 = arith.constant 2 : index
    %c0_27 = arith.constant 0 : index
    %c0_28 = arith.constant 0 : index
    %38 = vector.load %arg2[%c0_25, %c2_26, %c0_27, %c0_28] : memref<1x4x2x128xf32, #tpu.memory_space<vmem>>, vector<1x1x2x128xf32>
    %39 = vector.shape_cast %38 : vector<1x1x2x128xf32> to vector<2x128xf32>
    %40 = arith.subf %39, %19 : vector<2x128xf32>
    %41 = math.exp %40 : vector<2x128xf32>
    %42 = arith.addf %34, %41 : vector<2x128xf32>
    %c2_i32 = arith.constant 2 : i32
    %43 = vector.broadcast %c2_i32 : i32 to vector<2x128xi32>
    %44 = arith.cmpi eq, %8, %43 : vector<2x128xi32>
    %45 = arith.select %44, %39, %37 : vector<2x128xi1>, vector<2x128xf32>
    %c0_29 = arith.constant 0 : index
    %c3_30 = arith.constant 3 : index
    %c0_31 = arith.constant 0 : index
    %c0_32 = arith.constant 0 : index
    %46 = vector.load %arg2[%c0_29, %c3_30, %c0_31, %c0_32] : memref<1x4x2x128xf32, #tpu.memory_space<vmem>>, vector<1x1x2x128xf32>
    %47 = vector.shape_cast %46 : vector<1x1x2x128xf32> to vector<2x128xf32>
    %48 = arith.subf %47, %19 : vector<2x128xf32>
    %49 = math.exp %48 : vector<2x128xf32>
    %50 = arith.addf %42, %49 : vector<2x128xf32>
    %c3_i32 = arith.constant 3 : i32
    %51 = vector.broadcast %c3_i32 : i32 to vector<2x128xi32>
    %52 = arith.cmpi eq, %8, %51 : vector<2x128xi32>
    %53 = arith.select %52, %47, %45 : vector<2x128xi1>, vector<2x128xf32>
    %54 = math.log %50 : vector<2x128xf32>
    %55 = arith.addf %19, %54 : vector<2x128xf32>
    %56 = arith.subf %53, %55 : vector<2x128xf32>
    %57 = math.exp %56 : vector<2x128xf32>
    %cst_33 = arith.constant 1.000000e+00 : f32
    %58 = vector.broadcast %cst_33 : f32 to vector<2x128xf32>
    %59 = arith.subf %58, %57 : vector<2x128xf32>
    %60 = arith.mulf %59, %59 : vector<2x128xf32>
    %cst_34 = arith.constant 0.000000e+00 : f32
    %61 = vector.broadcast %cst_34 : f32 to vector<2x128xf32>
    %62 = arith.subf %61, %60 : vector<2x128xf32>
    %63 = arith.mulf %62, %56 : vector<2x128xf32>
    %c0_i32_35 = arith.constant 0 : i32
    %64 = arith.addi %0, %c0_i32_35 : i32
    %65 = vector.broadcast %64 : i32 to vector<2x128xi32>
    %66 = arith.addi %6, %65 : vector<2x128xi32>
    %c256_i32_36 = arith.constant 256 : i32
    %67 = vector.broadcast %c256_i32_36 : i32 to vector<2x128xi32>
    %68 = arith.cmpi slt, %66, %67 : vector<2x128xi32>
    %cst_37 = arith.constant 0.000000e+00 : f32
    %69 = vector.broadcast %cst_37 : f32 to vector<2x128xf32>
    %70 = arith.select %68, %63, %69 : vector<2x128xi1>, vector<2x128xf32>
    %cst_38 = arith.constant dense<0.000000e+00> : vector<128xf32>
    %71 = vector.multi_reduction <add>, %70, %cst_38 [0] : vector<2x128xf32> to vector<128xf32>
    %72 = vector.shape_cast %71 : vector<128xf32> to vector<1x128xf32>
    %73 = arith.addf %1, %72 : vector<1x128xf32>
    %74 = vector.shape_cast %73 : vector<1x128xf32> to vector<1x1x1x128xf32>
    %c0_39 = arith.constant 0 : index
    %c0_40 = arith.constant 0 : index
    %c0_41 = arith.constant 0 : index
    %c0_42 = arith.constant 0 : index
    %75 = vector.load %arg4[%c0_39, %c0_40, %c0_41, %c0_42] : memref<1x1x1x128xf32, #tpu.memory_space<vmem>>, vector<1x1x1x128xf32>
    tpu.vector_store %arg4[%c0_39, %c0_40, %c0_41, %c0_42], %74 {strides = array<i32>} : memref<1x1x1x128xf32, #tpu.memory_space<vmem>>, vector<1x1x1x128xf32>,
    return
  }
  func.func @transform_0(%arg0: i32, %arg1: i32) -> (i32, i32, i32, i32) {
    %c0_i32 = arith.constant 0 : i32
    %c0_i32_0 = arith.constant 0 : i32
    %c0_i32_1 = arith.constant 0 : i32
    return %arg0, %c0_i32, %arg1, %c0_i32_0 : i32, i32, i32, i32
  }
  func.func @transform_1(%arg0: i32, %arg1: i32) -> (i32, i32, i32) {
    %c0_i32 = arith.constant 0 : i32
    %c0_i32_0 = arith.constant 0 : i32
    return %arg0, %arg1, %c0_i32 : i32, i32, i32
  }
  func.func @transform_2(%arg0: i32, %arg1: i32) -> (i32, i32, i32, i32) {
    %c0_i32 = arith.constant 0 : i32
    %c0_i32_0 = arith.constant 0 : i32
    %c0_i32_1 = arith.constant 0 : i32
    return %arg0, %arg1, %c0_i32, %c0_i32_0 : i32, i32, i32, i32
  }
}

</mosaic_0001>

<bundles_post_ra>
// kernel: tpu_custom_call.1
= control target key start
LH: loop header
LB: loop body
LE: loop exit
PB: predicated region body
PF: predicated region fallthrough
CT: control target
= control target key end

     0   :  { %7 = vsyncpa [#allocation3], 0  ;;  %s883_s0 = inlined_call_operand.hbm [shape: f32[2,4,2,128], index: 0, kind: input, shape index: {}]   ;;  %s884_s1 = inlined_call_operand.hbm [shape: s32[2,2,128], index: 1, kind: input, shape index: {}]   ;;  %s885_s2 = inlined_call_operand.hbm [shape: f32[2,1,1,128], index: 2, kind: output, shape index: {}]  }
   0x1   :  { %9 = vsyncpa [#allocation3 + $0x1], 0 }
   0x2   :  { %10 = vsyncpa [#allocation6], 0 }
   0x3   :  { %12 = vsyncpa [#allocation6 + $0x1], 0 }
   0x4   :  { %13 = vsyncpa [#allocation4], 0 }
   0x5   :  { %15 = vsyncpa [#allocation4 + $0x1], 0  ;;  %s667_s9 = smov 0   ;;  %s669_s10 = smov 0  }
   0x6   :  { %s671_s11 = smov 0   ;;  %s673_s12 = smov 0  }
   0x7   :  { %s675_s13 = smov 0   ;;  %s677_s14 = smov 0  }
   0x8 LB: > { %s399_s15 = sadd.s32 4294967295, %s645_s14   ;;  %s400_s16 = sadd.s32 4294967294, %s645_s14   ;;  %s645_s14 = sphi %s677_s14, %s21_s14   ;;  %s641_s13 = sphi %s675_s13, %s904_s13   ;;  %s637_s12 = sphi %s673_s12, %s903_s12   ;;  %s633_s11 = sphi %s671_s11, %s902_s11   ;;  %s629_s10 = sphi %s669_s10, %s901_s10   ;;  %s625_s9 = sphi %s667_s9, %s900_s9  }
   0x9   : > { %s33_s17 = sadd.s32 1, %s641_s13  ;;  %s42_s18 = sadd.s32 1, %s633_s11 }
   0xa   : > { %p35_p0 = scmp.ge.s32.totalorder %s33_s17, 2  ;;  %p49_p1 = scmp.ne.s32.totalorder %s633_s11, %s629_s10 }
   0xb   : > { %p50_p2 = scmp.eq.s32.totalorder %s645_s14, 0  ;;  %p55_p3 = scmp.ne.s32.totalorder %s629_s10, %s625_s9 }
   0xc   : > { %s906_s17 = smov (%p35_p0, %s33_s17), 0  ;;  %p56_p5 = scmp.eq.s32.totalorder %s399_s15, 0 }
   0xd   : > { %p708_p4 = por %p50_p2, %p49_p1  ;;  %s37_s20 = ssub.s32 %s641_s13, %s906_s17 }
   0xe   : > { %p109_p6 = scmp.eq.s32.totalorder %s399_s15, 1  ;;  %p40_p7 = scmp.eq.s32.totalorder %s37_s20, 0 }
   0xf   : > { %p714_p8 = por %p56_p5, %p55_p3  ;;  %p115_p10 = scmp.eq.s32.totalorder %s400_s16, 1 }
  0x10   : > { %p718_p9 = por %p109_p6, %p49_p1  ;;  %p435_p13 = scmp.lt.s32.totalorder %s645_s14, 2 }
  0x11   : > { %s889_s21 = scalar_select %p714_p8, 1, 0 }
  0x12   : > { %s890_s22 = scalar_select %p718_p9, 1, 0 }
  0x13   : > { %s723_s23 = scalar_select %p40_p7, %s633_s11, %s42_s18  }
  0x14   : > { %p725_p11 = por %p115_p10, %p55_p3  ;;  %s732_s25 = sand.u32 1, %s633_s11  }
  0x15   : > { %s403_s26 = sshll.u32 %s732_s25, 3  ;;  %s417_s27 = sshll.u32 %s641_s13, 7 }
  0x16   : > { %s891_s24 = scalar_select %p725_p11, 1, 0 }
  0x17   : > { %s739_s30 = scalar_lea.hbm %s883_s0, %s417_s27  ;;  %s139_s3 = scalar_lea.vmem [#allocation2], %s403_s26 }
  0x18   : > { %s147_s4 = sshll.u32 %s139_s3, 4  ;;  %p745_p0 = pnand %p435_p13, %p708_p4  ;;  %s741_s4 = int_to_ptr.vmem [resolvable:$true] %s147_s4 }
  0x19   : > { %s136_s6 = scalar_lea.sflag [#allocation3], %s732_s25  ;;  %s499_s7 = scalar_lea.hbm %s739_s30, 128 }
  0x1a   : > { %p500_p2 = scmp.ne.s32.totalorder %s739_s30, %s499_s7  ;;  %p501_p3 = pneg %p745_p0 }
  0x1b   : > { %s504_s16 = scalar_lea.hbm %s883_s0, 256  ;;  %p505_p4 = scmp.lt.u32.totalorder %s739_s30, %s883_s0 }
  0x1c   : > { %p502_p5 = pnand %p501_p3, %p500_p2  ;;  %p506_p7 = scmp.lt.u32.totalorder %s504_s16, %s499_s7 }
  0x1d   : > { %p508_p13 = scmp.lt.u32.totalorder %s499_s7, %s739_s30 }
  0x1e   : > { %p503_p6 = pneg %p502_p5  ;;  %p507_p10 = por %p506_p7, %p505_p4 }
  0x20   : > { %p509_p12 = por %p508_p13, %p507_p10 }
  0x22   : > { %p510_p1 = pnand %p509_p12, %p503_p6 }
  0x24   : > { %513 = shalt.err (!%p510_p1)
}
  0x25   : > { %s514_s20 = scalar_lea.vmem %s741_s4, 128  ;;  %s647_s26 = smov [#allocation2]  }
  0x26   : > { %p515_p2 = scmp.ne.s32.totalorder %s741_s4, %s514_s20  ;;  %s519_s27 = sshll.u32 %s647_s26, 4  ;;  %s520_s27 = int_to_ptr.vmem [resolvable:$false] %s519_s27 }
  0x27   : > { %s521_s28 = scalar_lea.vmem %s520_s27, 256  ;;  %p522_p9 = scmp.lt.s32.totalorder %s741_s4, %s520_s27 }
  0x28   : > { %p517_p5 = pnand %p515_p2, %p501_p3  ;;  %p523_p4 = scmp.lt.s32.totalorder %s521_s28, %s514_s20 }
  0x2a   : > { %p518_p11 = pneg %p517_p5  ;;  %p524_p7 = por %p523_p4, %p522_p9 }
  0x2c   : > { %p525_p10 = pnand %p524_p7, %p518_p11 }
  0x2e   : > { %528 = shalt.err (!%p525_p10)
}
  0x2f   : > { %s648_s29 = smov 32   ;;  %s649_s3 = smov 2  }
  0x30   : > { %427 = dma.hbm_to_vmem [thread:$0]  (!%p745_p0), %s739_s30, 128, %s741_s4, %s136_s6, %s648_s29, %s648_s29, %s649_s3  }
  0x31   : > { %p174_p12 = scmp.lt.s32.totalorder %s645_s14, 3  ;;  %s406_s7 = sshll.u32 %s732_s25, 1 }
  0x32   : > { %s407_s8 = sshll.u32 %s641_s13, 5  ;;  %p893_p9 = scmp.ge.s32.totalorder %s645_s14, 1 }
  0x33   : > { %s790_s19 = scalar_lea.hbm %s884_s1, %s407_s8  ;;  %s161_s20 = scalar_lea.vmem [#allocation5], %s406_s7 }
  0x34   : > { %p783_p11 = pnand %p893_p9, %p174_p12  ;;  %s169_s26 = sshll.u32 %s161_s20, 4  ;;  %s170_s26 = int_to_ptr.vmem [resolvable:$true] %s169_s26 }
  0x35   : > { %s158_s30 = scalar_lea.sflag [#allocation6], %s732_s25  ;;  %s529_s4 = scalar_lea.hbm %s790_s19, 32 }
  0x36   : > { %s894_s15 = scalar_select %p783_p11, 1, 0 }
  0x37   : > { %p530_p1 = scmp.ne.s32.totalorder %s790_s19, %s529_s4  ;;  %s534_s28 = scalar_lea.hbm %s884_s1, 64 }
  0x38   : > { %p535_p2 = scmp.lt.u32.totalorder %s790_s19, %s884_s1  ;;  %p536_p5 = scmp.lt.u32.totalorder %s534_s28, %s529_s4 }
  0x39   : > { %p532_p6 = pnand %p530_p1, %p501_p3  ;;  %p538_p7 = scmp.lt.u32.totalorder %s529_s4, %s790_s19 }
  0x3a   : > { %p537_p4 = por %p536_p5, %p535_p2 }
  0x3b   : > { %p533_p13 = pneg %p532_p6 }
  0x3c   : > { %p539_p10 = por %p538_p7, %p537_p4 }
  0x3e   : > { %p540_p12 = pnand %p539_p10, %p533_p13 }
  0x40   : > { %543 = shalt.err (!%p540_p12)
}
  0x41   : > { %s544_s25 = scalar_lea.vmem %s170_s26, 32  ;;  %s650_s7 = smov [#allocation5]  }
  0x42   : > { %p545_p9 = scmp.ne.s32.totalorder %s170_s26, %s544_s25  ;;  %s549_s8 = sshll.u32 %s650_s7, 4  ;;  %s550_s8 = int_to_ptr.vmem [resolvable:$false] %s549_s8 }
  0x43   : > { %s551_s16 = scalar_lea.vmem %s550_s8, 64  ;;  %p552_p8 = scmp.lt.s32.totalorder %s170_s26, %s550_s8 }
  0x44   : > { %p547_p1 = pnand %p545_p9, %p501_p3  ;;  %p553_p11 = scmp.lt.s32.totalorder %s551_s16, %s544_s25 }
  0x46   : > { %p548_p6 = pneg %p547_p1  ;;  %p554_p2 = por %p553_p11, %p552_p8 }
  0x48   : > { %p555_p5 = pnand %p554_p2, %p548_p6 }
  0x4a   : > { %558 = shalt.err (!%p555_p5)
}
  0x4b   : > { %430 = dma.hbm_to_vmem [thread:$0]  (!%p745_p0), %s790_s19, 32, %s170_s26, %s158_s30  }
  0x4c   : > { %p895_p13 = scmp.ne.s32.totalorder %s894_s15, 0 }
  0x4d   : > { %s815_s18 = sand.u32 (!%p895_p13), 1, %s629_s10   ;;  %p896_p3 = scmp.ne.s32.totalorder (!%p895_p13), %s889_s21, 0 }
  0x4e   : > { %178 = sbr.rel (%p895_p13) target bundleno = 184 (0xb8), region = 28  ;;  %s409_s20 = sshll.u32 (!%p895_p13), %s815_s18, 3 }
  0x4f   : > { %s181_s4 = scalar_lea.sflag (!%p895_p13), [#allocation3], %s815_s18  ;;  %s184_s6 = scalar_lea.vmem (!%p895_p13), [#allocation2], %s409_s20 }
  0x55   : > { %612 = dma.done.wait (%p896_p3), %s181_s4, 128  }
  0x56   : > { %614 = vsyncadd (%p896_p3), %s181_s4, 4294967168  ;;  %s410_s5 = sshll.u32 %s815_s18, 1  ;;  %s190_s15 = scalar_lea.sflag [#allocation6], %s815_s18 }
  0x57   : > { %s193_s19 = scalar_lea.vmem [#allocation5], %s410_s5 }
  0x58   : > { %616 = dma.done.wait (%p896_p3), %s190_s15, 32  }
  0x59   : > { %618 = vsyncadd (%p896_p3), %s190_s15, 4294967264  ;;  %v226_v0 = vld [vmem:[%s184_s6] sm:$0x3]  ;;  %v411_v1 = vld [vmem:[%s184_s6 + $0x2] sm:$0x3]  ;;  %v219_v32 = vlaneseq  ;;  %vm274_vm5 = vcmask 1041408  }
  0x5a   : > { %v229_v2 = vmax.f32 %v226_v0, %v411_v1  ;;  %v412_v3 = vld [vmem:[%s184_s6 + $0x4] sm:$0x3]  ;;  %v413_v4 = vld [vmem:[%s184_s6 + $0x6] sm:$0x3]  ;;  %v225_v21 = vld [vmem:[%s193_s19] sm:$0x3] }
  0x5b   : > { %vm240_vm0 = vcmp.eq.s32.totalorder %v225_v21, 0  ;;  %vm246_vm1 = vcmp.eq.s32.totalorder %v225_v21, 1  ;;  %vm252_vm2 = vcmp.eq.s32.totalorder %v225_v21, 2  ;;  %vm258_vm3 = vcmp.eq.s32.totalorder %v225_v21, 3  ;;  %s217_s21 = scalar_lea.vmem [#allocation7], %s815_s18  ;;  %s414_s30 = sshll.u32 %s637_s12, 4 }
  0x5c   : > { %v232_v5 = vmax.f32 %v229_v2, %v412_v3  ;;  %v241_v23 = vsel %vm240_vm0, %v226_v0, 0.0  ;;  %v220_v33 = vshrl.u32 %v219_v32, 7  ;;  %v223_v35 = vand.u32 127, %v219_v32  ;;  %s298_s26 = sshll.u32 %s217_s21, 4  ;;  %s836_s29 = scalar_lea.hbm %s885_s2, %s414_s30  ;;  %s831_s26 = int_to_ptr.vmem [resolvable:$true] %s298_s26 }
  0x5d   : > { %v247_v24 = vsel %vm246_vm1, %v411_v1, %v241_v23  ;;  %s285_s3 = scalar_lea.sflag [#allocation4], %s815_s18  ;;  %s559_s25 = scalar_lea.vmem %s831_s26, 16 }
  0x5e   : > { %v235_v6 = vmax.f32 %v232_v5, %v413_v4  ;;  %v253_v25 = vsel %vm252_vm2, %v412_v3, %v247_v24  ;;  %v221_v34 = vmul.u32 128, %v220_v33  ;;  %p560_p8 = scmp.ne.s32.totalorder %s831_s26, %s559_s25  ;;  %p897_p0 = scmp.ne.s32.totalorder %s890_s22, 0 }
  0x5f   : > { %v259_v28 = vsel %vm258_vm3, %v413_v4, %v253_v25  ;;  %s651_s12 = smov [#allocation7]  }
  0x60   : > { %v236_v7 = vsub.f32 %v226_v0, %v235_v6  ;;  %v242_v8 = vsub.f32 %v411_v1, %v235_v6  ;;  %v248_v9 = vsub.f32 %v412_v3, %v235_v6  ;;  %v254_v10 = vsub.f32 %v413_v4, %v235_v6  ;;  %p561_p11 = pnand %p560_p8, %p897_p0  ;;  %s563_s7 = sshll.u32 %s651_s12, 4  ;;  %s564_s7 = int_to_ptr.vmem [resolvable:$false] %s563_s7 }
  0x61   : > { %v224_v38 = vadd.s32 %v223_v35, %v221_v34  ;;  %s565_s8 = scalar_lea.vmem %s564_s7, 32  ;;  %p566_p7 = scmp.lt.s32.totalorder %s831_s26, %s564_s7 }
  0x62   : > { %v237_v11 = vmul.f32 1.442695, %v236_v7  ;;  %v243_v12 = vmul.f32 1.442695, %v242_v8  ;;  %v249_v13 = vmul.f32 1.442695, %v248_v9  ;;  %p562_p4 = pneg %p561_p11  ;;  %p567_p10 = scmp.lt.s32.totalorder %s565_s8, %s559_s25 }
  0x63   : > { %v255_v14 = vmul.f32 1.442695, %v254_v10  ;;  %vm272_vm4 = vcmp.lt.s32.totalorder %v224_v38, 256 }
  0x64   : > { %487 = vpow2.f32 %v237_v11  ;;  %p568_p12 = por %p567_p10, %p566_p7 }
  0x65   : > { %489 = vpow2.f32 %v243_v12 }
  0x66   : > { %491 = vpow2.f32 %v249_v13  ;;  %p569_p9 = pnand %p568_p12, %p562_p4 }
  0x67   : > { %493 = vpow2.f32 %v255_v14 }
  0x6e   : > { %v488_v15 = vpop.eup %487 }
  0x6f   : > { %v490_v16 = vpop.eup %489 }
  0x70   : > { %v492_v17 = vpop.eup %491  ;;  %v245_v18 = vadd.f32 %v490_v16, %v488_v15 }
  0x71   : > { %v494_v19 = vpop.eup %493 }
  0x72   : > { %v251_v20 = vadd.f32 %v492_v17, %v245_v18 }
  0x74   : > { %v257_v22 = vadd.f32 %v494_v19, %v251_v20 }
  0x76   : > { %495 = vlog2.f32 %v257_v22 }
  0x80   : > { %v496_v26 = vpop.eup %495 }
  0x81   : > { %v261_v27 = vmul.f32 0.6931472, %v496_v26 }
  0x83   : > { %v262_v29 = vadd.f32 %v261_v27, %v235_v6 }
  0x85   : > { %v263_v30 = vsub.f32 %v259_v28, %v262_v29 }
  0x87   : > { %v264_v31 = vmul.f32 1.442695, %v263_v30 }
  0x89   : > { %497 = vpow2.f32 %v264_v31 }
  0x93   : > { %v498_v36 = vpop.eup %497 }
  0x94   : > { %v266_v37 = vsub.f32 1.0, %v498_v36 }
  0x96   : > { %v267_v39 = vmul.f32 %v266_v37, %v266_v37 }
  0x98   : > { %v268_v40 = vsub.f32 0.0, %v267_v39 }
  0x9a   : > { %v269_v41 = vmul.f32 %v268_v40, %v263_v30 }
  0x9c   : > { %v273_v42 = vsel %vm272_vm4, %v269_v41, 0.0 }
  0x9d   : > { %v275_v43 = vsel %vm274_vm5, %v273_v42, 0.0 }
  0x9e   : > { %v276_v44 = vrot.slane %v275_v43, 4 }
  0xa0   : > { %v277_v45 = vadd.f32 %v276_v44, %v275_v43 }
  0xa2   : > { %v278_v46 = vrot.slane %v277_v45, 2 }
  0xa4   : > { %v279_v47 = vadd.f32 %v278_v46, %v277_v45 }
  0xa6   : > { %v280_v48 = vrot.slane %v279_v47, 1 }
  0xa8   : > { %v281_v49 = vadd.f32 %v280_v48, %v279_v47 }
  0xaa   : > { %283 = vst [vmem:[%s217_s21] sm:$0x1] %v281_v49 }
  0xab   : > { %572 = shalt.err (!%p569_p9)
}
  0xac   : > { %s573_s16 = scalar_lea.hbm %s836_s29, 16  ;;  %s577_s4 = scalar_lea.hbm %s885_s2, 32 }
  0xad   : > { %p574_p1 = scmp.ne.s32.totalorder %s836_s29, %s573_s16  ;;  %p578_p5 = scmp.lt.u32.totalorder %s836_s29, %s885_s2 }
  0xae   : > { %p579_p13 = scmp.lt.u32.totalorder %s577_s4, %s573_s16  ;;  %p581_p8 = scmp.lt.u32.totalorder %s573_s16, %s836_s29 }
  0xaf   : > { %p575_p6 = pnand %p574_p1, %p897_p0 }
  0xb0   : > { %p580_p3 = por %p579_p13, %p578_p5 }
  0xb1   : > { %p576_p2 = pneg %p575_p6 }
  0xb2   : > { %p582_p11 = por %p581_p8, %p580_p3 }
  0xb4   : > { %p583_p4 = pnand %p582_p11, %p576_p2 }
  0xb6   : > { %586 = shalt.err (!%p583_p4)
}
  0xb7   : > { %422 = dma.vmem_to_hbm [thread:$0]  (%p897_p0), %s831_s26, 16, %s836_s29, %s285_s3  }
  0xb8 PF: > { %s310_s15 = sand.u32 1, %s625_s9   ;;  %p898_p7 = scmp.ne.s32.totalorder %s891_s24, 0 }
  0xb9   : > { %p899_p10 = scmp.ge.s32.totalorder %s645_s14, 2  ;;  %s311_s19 = scalar_lea.sflag [#allocation4], %s310_s15 }
  0xbb   : > { %p432_p12 = pnand %p899_p10, %p898_p7 }
  0xbd   : > { %620 = dma.done.wait (!%p432_p12), %s311_s19, 16  }
  0xbe   : > { %622 = vsyncadd (!%p432_p12), %s311_s19, 4294967280  ;;  %s21_s14 = sadd.s32 1, %s645_s14   ;;  %s900_s9 = smov %s629_s10 }
  0xbf   : > { %p18_p9 = scmp.ge.s32.totalorder %s21_s14, 4   ;;  %s901_s10 = smov %s633_s11 }
  0xc0   : > { %s902_s11 = smov %s723_s23  ;;  %s903_s12 = smov %s641_s13 }
  0xc1   : > { %s904_s13 = smov %s906_s17  ;;  %20 = sbr.rel (!%p18_p9) target bundleno = 8 (0x8), region = 89 }
  0xc8   :  { %315 = vsyncpa [#allocation3], 1 }
  0xc9   :  { %317 = vsyncpa [#allocation3 + $0x1], 1 }
  0xca   :  { %318 = vsyncpa [#allocation6], 1 }
  0xcb   :  { %320 = vsyncpa [#allocation6 + $0x1], 1 }
  0xcc   :  { %321 = vsyncpa [#allocation4], 1 }
  0xcd   :  { %323 = vsyncpa [#allocation4 + $0x1], 1 }

</bundles_post_ra>
